<compile_context>
chip_gen: v5e
topology: v5e:2x2
jax: 0.10.0
libtpu: 0.0.40
codegen_flags: <defaults>
</compile_context>

<pallas_src>
import functools

import numpy as np
import jax
import jax.numpy as jnp
from jax.experimental import pallas as pl
from jax.experimental.pallas import tpu as pltpu


# Levels with fewer spatial elements than this are pooled with plain XLA
# (Pallas launch overhead dominates).  Kept low here so the demo exercises the
# kernel; ~2048 is a reasonable production value.
_MIN_PALLAS_HW = 256


# ----------------------------------------------------------------------------
# Kernel: weighted spatial pooling (row-wise weighted sum over HW).
#   x_ref: (rb, t)  tile of the level, rows = flattened (N, C), lanes = HW tile
#   w_ref: (1, t)   per-pixel weight = replication_count / (Hmax * Wmax),
#                   zero-padded past HW on the host
#   o_ref: (rb, 1)  resident accumulator across the HW (k) grid axis
# ----------------------------------------------------------------------------
def _weighted_pool_kernel(x_ref, w_ref, o_ref, *, hw, tile, masked):
    k = pl.program_id(1)

    @pl.when(k == 0)
    def _init():
        o_ref[...] = jnp.zeros_like(o_ref)

    # Upcast inside the kernel: bf16 activations halve HBM bytes on this
    # bandwidth-bound op; accumulation stays f32 (v5e-safe).
    x = x_ref[...].astype(jnp.float32)          # (rb, t)
    w = w_ref[...]                              # (1, t) f32
    prod = x * w

    if masked:
        # Last spatial tile reads past HW; Pallas pads with *unspecified*
        # values (possibly NaN/Inf), so mask the product explicitly.
        lane = jax.lax.broadcasted_iota(jnp.int32, prod.shape, 1)
        prod = jnp.where(k * tile + lane < hw, prod, 0.0)

    o_ref[...] += jnp.sum(prod, axis=-1, keepdims=True)


# ----------------------------------------------------------------------------
# Tiling heuristics.
# ----------------------------------------------------------------------------
def _pick_row_block(rows, cap=256):
    """Row (sublane) block: full extent when tiny, otherwise a multiple of 8.
    Splits into >=2 blocks when possible so the 'parallel' row axis can feed
    both v7x TensorCores; cdiv handles non-divisible row counts safely because
    the reduction is per-row independent."""
    if rows < 16:
        return rows
    half = -(-rows // 2)
    rb = min(cap, ((half + 7) // 8) * 8)
    return min(rb, rows)


def _pick_hw_tile(hw, rb, itemsize, x_budget_bytes=24 << 20):
    """Largest multiple-of-128 spatial tile whose double-buffered x fits the
    budget (~24 MiB: safe inside v7x's 64 MiB VMEM with vmem_limit=48 MiB, and
    well below v5e/v6e scoped limits)."""
    if hw <= 128:
        return hw                       # full extent (always legal)
    max_t = x_budget_bytes // (2 * rb * itemsize)
    t = min(hw, max_t)
    t = (t // 128) * 128
    return max(t, 128)


# ----------------------------------------------------------------------------
# Per-level weighted spatial mean.
#   x_nchw:   (N, C, H, W)  any float dtype (f32 or bf16)
#   w_sp_np:  (H*W,) numpy f32, sums to 1
# Returns (N, C) f32.
# ----------------------------------------------------------------------------
def _weighted_spatial_pool(x_nchw, w_sp_np):
    N, C, H, W = x_nchw.shape
    HW = H * W
    R = N * C
    x2 = x_nchw.reshape(R, HW)          # free reshape (contiguous NCHW)

    if HW < _MIN_PALLAS_HW:
        # Tiny deep level: a Pallas launch is pure overhead; one XLA matvec.
        w = jnp.asarray(w_sp_np, jnp.float32)
        return jnp.dot(x2.astype(jnp.float32), w).reshape(N, C)

    rb = _pick_row_block(R)
    t = _pick_hw_tile(HW, rb, x2.dtype.itemsize)
    kk = pl.cdiv(HW, t)
    needs_mask = (HW % t) != 0

    # Zero-pad the (tiny, host-built) weight to the grid extent so its blocks
    # never read Pallas-padded memory.
    w_pad = np.zeros((1, kk * t), np.float32)
    w_pad[0, :HW] = w_sp_np
    w_pad = jnp.asarray(w_pad)

    kernel = functools.partial(
        _weighted_pool_kernel, hw=HW, tile=t, masked=needs_mask)

    out = pl.pallas_call(
        kernel,
        out_shape=jax.ShapeDtypeStruct((R, 1), jnp.float32),
        grid_spec=pltpu.PrefetchScalarGridSpec(
            num_scalar_prefetch=0,
            grid=(pl.cdiv(R, rb), kk),           # reduction axis last
            in_specs=[
                pl.BlockSpec((rb, t), lambda r, k: (r, k)),
                pl.BlockSpec((1, t), lambda r, k: (0, k)),
            ],
            out_specs=pl.BlockSpec((rb, 1), lambda r, k: (r, 0)),
        ),
        compiler_params=pltpu.CompilerParams(
            dimension_semantics=("parallel", "arbitrary"),
            vmem_limit_bytes=48 << 20),
        cost_estimate=pl.CostEstimate(
            flops=2 * R * HW,
            transcendentals=0,
            bytes_accessed=R * HW * x2.dtype.itemsize + kk * t * 4 + R * 4),
    )(x2, w_pad)

    return out.reshape(N, C)


# ----------------------------------------------------------------------------
# Glue (all static / tiny).
# ----------------------------------------------------------------------------
def _nearest_counts(in_size, out_size):
    """torch.nn.Upsample(mode='nearest'): src = floor(dst * in / out).
    Returns count[i] = number of output positions that read source index i."""
    idx = (np.arange(out_size) * in_size) // out_size
    return np.bincount(idx, minlength=in_size).astype(np.float64)


def retrieval_pyramid_head(in_feats, in_feat_idxs, conv_weight):
    """
    in_feats: list of NCHW arrays (the full pyramid; f32 or bf16).
    in_feat_idxs: which pyramid levels to use.
    conv_weight: (emb_size, C_total, 1, 1) — PyTorch Conv2d weight layout.
    Returns torch.squeeze-equivalent of (N, emb_size, 1, 1) -> (N, emb_size).
    """
    selected = [in_feats[i] for i in in_feat_idxs]
    max_h = max(int(f.shape[2]) for f in selected)
    max_w = max(int(f.shape[3]) for f in selected)

    # Per-level weighted spatial mean at NATIVE resolution.  Weighting each
    # source pixel by its nearest-neighbor replication count / (Hmax*Wmax) is
    # exactly equivalent to upsample-then-global-mean, including non-divisible
    # H/W ratios.
    pooled = []
    for f in selected:
        _, _, h, w = f.shape
        ch = _nearest_counts(h, max_h)
        cw = _nearest_counts(w, max_w)
        w_sp = (np.outer(ch, cw).reshape(-1)
                / float(max_h * max_w)).astype(np.float32)
        pooled.append(_weighted_spatial_pool(f, w_sp))

    m = jnp.concatenate(pooled, axis=1)                  # (N, C_total), tiny

    # 1x1 conv weight (E, C, 1, 1) -> (C, E).  Because avg-pool commutes with
    # the 1x1 conv, one tiny matmul replaces the per-pixel convolution.  Left
    # to XLA: a Pallas launch here is pure fixed cost.
    w_mat = jnp.transpose(conv_weight[:, :, 0, 0], (1, 0)).astype(jnp.float32)
    out = jnp.dot(m, w_mat, preferred_element_type=jnp.float32)   # (N, E)

    # Matches torch.squeeze (also drops batch dim when N == 1).
    return jnp.squeeze(out)


# Reference-only helper (matches torch.nn.Upsample nearest indexing).
def _nearest_upsample_nchw(f, out_h, out_w):
    _, _, h, w = f.shape
    idx_h = (jnp.arange(out_h) * h) // out_h
    idx_w = (jnp.arange(out_w) * w) // out_w
    return f[:, :, idx_h, :][:, :, :, idx_w]


if __name__ == "__main__":
    key = jax.random.PRNGKey(0)

    # Small pyramid, chosen so the Pallas kernel exercises both the masked
    # partial-tile path (30*30 = 900, tile 896) and the exact-tile path
    # (16*16 = 256), plus the plain-XLA tiny-level path (8*8 = 64).
    batch = 2
    feat_shapes = [(4, 30, 30), (8, 16, 16), (16, 8, 8)]
    in_feat_idxs = [0, 1, 2]
    emb_size = 32

    keys = jax.random.split(key, len(feat_shapes) + 1)
    in_feats = [
        jax.random.normal(keys[i], (batch,) + feat_shapes[i], dtype=jnp.float32)
        for i in range(len(feat_shapes))
    ]

    num_channels = sum(feat_shapes[i][0] for i in in_feat_idxs)
    conv_weight = (
        jax.random.normal(keys[-1], (emb_size, num_channels, 1, 1),
                          dtype=jnp.float32)
        * (1.0 / jnp.sqrt(num_channels))
    )

    out = retrieval_pyramid_head(in_feats, in_feat_idxs, conv_weight)
    out = jax.block_until_ready(out)

    # Pure-JAX reference: upsample -> concat -> 1x1 conv -> global avg pool.
    def _ref():
        sel = [in_feats[i] for i in in_feat_idxs]
        mh = max(f.shape[2] for f in sel)
        mw = max(f.shape[3] for f in sel)
        xs = [_nearest_upsample_nchw(f, mh, mw) for f in sel]
        x = jnp.concatenate(xs, axis=1)                      # (N, C, H, W)
        y = jnp.einsum("nchw,ec->nehw", x, conv_weight[:, :, 0, 0])
        return jnp.mean(y, axis=(2, 3))

    ref = _ref()
    assert out.shape == (batch, emb_size), out.shape
    assert jnp.allclose(out, ref, atol=1e-4, rtol=1e-4), float(
        jnp.max(jnp.abs(out - ref)))

    print("KERNEL_OK")
</pallas_src>

<mosaic_0001>
module attributes {stable_mosaic.version = 11 : i64} {
  func.func @_weighted_pool_kernel(%arg0: i32, %arg1: i32, %arg2: memref<8x896xf32, #tpu.memory_space<vmem>>, %arg3: memref<1x896xf32, #tpu.memory_space<vmem>>, %arg4: memref<8x1xf32, #tpu.memory_space<vmem>>) attributes {dimension_semantics = [#tpu.dimension_semantics<parallel>, #tpu.dimension_semantics<arbitrary>], iteration_bounds = array<i64: 1, 2>, scalar_prefetch = 0 : i64, scratch_operands = 0 : i64, tpu.core_type = #tpu.core_type<tc>, window_params = [{transform_indices = @transform_0, window_bounds = array<i64: 8, 896>}, {transform_indices = @transform_1, window_bounds = array<i64: 1, 896>}, {transform_indices = @transform_2, window_bounds = array<i64: 8, 1>}]} {
    %c0_i32 = arith.constant 0 : i32
    %0 = arith.cmpi eq, %arg1, %c0_i32 : i32
    %1 = arith.extui %0 : i1 to i32
    %c0_i32_0 = arith.constant 0 : i32
    %2 = arith.cmpi ne, %1, %c0_i32_0 : i32
    scf.if %2 {
      %cst_9 = arith.constant 0.000000e+00 : f32
      %20 = vector.broadcast %cst_9 : f32 to vector<8x1xf32>
      %c0_10 = arith.constant 0 : index
      %c0_11 = arith.constant 0 : index
      %21 = vector.load %arg4[%c0_10, %c0_11] : memref<8x1xf32, #tpu.memory_space<vmem>>, vector<8x1xf32>
      tpu.vector_store %arg4[%c0_10, %c0_11], %20 {strides = array<i32>} : memref<8x1xf32, #tpu.memory_space<vmem>>, vector<8x1xf32>,
    } else {
    }
    %c0 = arith.constant 0 : index
    %c0_1 = arith.constant 0 : index
    %3 = vector.load %arg2[%c0, %c0_1] : memref<8x896xf32, #tpu.memory_space<vmem>>, vector<8x896xf32>
    %c0_2 = arith.constant 0 : index
    %c0_3 = arith.constant 0 : index
    %4 = vector.load %arg3[%c0_2, %c0_3] : memref<1x896xf32, #tpu.memory_space<vmem>>, vector<1x896xf32>
    %5 = vector.broadcast %4 : vector<1x896xf32> to vector<8x896xf32>
    %6 = arith.mulf %3, %5 : vector<8x896xf32>
    %7 = tpu.iota {dimensions = array<i32: 1>} : vector<8x896xi32>
    %c896_i32 = arith.constant 896 : i32
    %8 = arith.muli %arg1, %c896_i32 : i32
    %9 = vector.broadcast %8 : i32 to vector<8x896xi32>
    %10 = arith.addi %9, %7 : vector<8x896xi32>
    %c900_i32 = arith.constant 900 : i32
    %11 = vector.broadcast %c900_i32 : i32 to vector<8x896xi32>
    %12 = arith.cmpi slt, %10, %11 : vector<8x896xi32>
    %cst = arith.constant 0.000000e+00 : f32
    %13 = vector.broadcast %cst : f32 to vector<8x896xf32>
    %14 = arith.select %12, %6, %13 : vector<8x896xi1>, vector<8x896xf32>
    %c0_4 = arith.constant 0 : index
    %c0_5 = arith.constant 0 : index
    %15 = vector.load %arg4[%c0_4, %c0_5] : memref<8x1xf32, #tpu.memory_space<vmem>>, vector<8x1xf32>
    %cst_6 = arith.constant dense<0.000000e+00> : vector<8xf32>
    %16 = vector.multi_reduction <add>, %14, %cst_6 [1] : vector<8x896xf32> to vector<8xf32>
    %17 = vector.shape_cast %16 : vector<8xf32> to vector<8x1xf32>
    %18 = arith.addf %15, %17 : vector<8x1xf32>
    %c0_7 = arith.constant 0 : index
    %c0_8 = arith.constant 0 : index
    %19 = vector.load %arg4[%c0_7, %c0_8] : memref<8x1xf32, #tpu.memory_space<vmem>>, vector<8x1xf32>
    tpu.vector_store %arg4[%c0_7, %c0_8], %18 {strides = array<i32>} : memref<8x1xf32, #tpu.memory_space<vmem>>, vector<8x1xf32>,
    return
  }
  func.func @transform_0(%arg0: i32, %arg1: i32) -> (i32, i32) {
    %c0_i32 = arith.constant 0 : i32
    return %arg0, %arg1 : i32, i32
  }
  func.func @transform_1(%arg0: i32, %arg1: i32) -> (i32, i32) {
    %c0_i32 = arith.constant 0 : i32
    %c0_i32_0 = arith.constant 0 : i32
    return %c0_i32, %arg1 : i32, i32
  }
  func.func @transform_2(%arg0: i32, %arg1: i32) -> (i32, i32) {
    %c0_i32 = arith.constant 0 : i32
    %c0_i32_0 = arith.constant 0 : i32
    return %arg0, %c0_i32 : i32, i32
  }
}

</mosaic_0001>

<bundles_post_ra>
// kernel: tpu_custom_call.1
= control target key start
LH: loop header
LB: loop body
LE: loop exit
PB: predicated region body
PF: predicated region fallthrough
CT: control target
= control target key end

     0   :  { %7 = vsyncpa [#allocation3], 0  ;;  %s758_s0 = inlined_call_operand.hbm [shape: f32[8,900], index: 0, kind: input, shape index: {}]   ;;  %s759_s1 = inlined_call_operand.hbm [shape: f32[1,1792], index: 1, kind: input, shape index: {}]   ;;  %s760_s2 = inlined_call_operand.vmem [shape: f32[8,1], index: 2, kind: output, shape index: {}]  }
   0x1   :  { %9 = vsyncpa [#allocation3 + $0x1], 0 }
   0x2   :  { %10 = vsyncpa [#allocation5], 0 }
   0x3   :  { %12 = vsyncpa [#allocation5 + $0x1], 0  ;;  %s615_s9 = smov 0   ;;  %s617_s10 = smov 0  }
   0x4   :  { %s619_s11 = smov 0   ;;  %s621_s12 = smov 0  }
   0x5   :  { %s623_s13 = smov 0   ;;  %s625_s14 = smov 0  }
   0x6 LB: > { %s405_s15 = sadd.s32 4294967295, %s596_s14   ;;  %s27_s16 = sadd.s32 1, %s592_s13  ;;  %s596_s14 = sphi %s625_s14, %s18_s14   ;;  %s592_s13 = sphi %s623_s13, %s768_s13   ;;  %s588_s12 = sphi %s621_s12, %s767_s12   ;;  %s584_s11 = sphi %s619_s11, %s766_s11   ;;  %s580_s10 = sphi %s617_s10, %s765_s10   ;;  %s576_s9 = sphi %s615_s9, %s764_s9  }
   0x7   : > { %p28_p0 = scmp.ge.s32.totalorder %s27_s16, 2  ;;  %s39_s17 = sadd.s32 1, %s584_s11 }
   0x8   : > { %p46_p1 = scmp.ne.s32.totalorder %s584_s11, %s580_s10  ;;  %p47_p2 = scmp.eq.s32.totalorder %s596_s14, 0 }
   0x9   : > { %s770_s16 = smov (%p28_p0, %s27_s16), 0  ;;  %p52_p4 = scmp.ne.s32.totalorder %s580_s10, %s576_s9 }
   0xa   : > { %p651_p3 = por %p47_p2, %p46_p1  ;;  %s35_s19 = ssub.s32 %s592_s13, %s770_s16 }
   0xb   : > { %p53_p5 = scmp.eq.s32.totalorder %s405_s15, 0  ;;  %p37_p6 = scmp.eq.s32.totalorder %s35_s19, 0 }
   0xc   : > { %p407_p8 = scmp.ge.s32.totalorder %s596_s14, 2 }
   0xd   : > { %p658_p7 = por %p53_p5, %p52_p4 }
   0xe   : > { %s663_s21 = scalar_select %p37_p6, %s584_s11, %s39_s17  }
   0xf   : > { %124 = sbr.rel (%p407_p8) target bundleno = 63 (0x3f), region = 16 }
  0x14   : > { %127 = sbr.rel (!%p651_p3) target bundleno = 57 (0x39), region = 20  ;;  %s128_s22 = sand.u32 (%p651_p3), 1, %s584_s11  }
  0x15   : > { %s133_s23 = smul.u32 (%p651_p3), 7, %s592_s13  ;;  %s673_s29 = scalar_lea.sflag (%p651_p3), [#allocation3], %s128_s22 }
  0x16   : > { %s419_s24 = smul.u32 (%p651_p3), 56, %s128_s22 }
  0x17   : > { %s134_s25 = ssub.s32 (%p651_p3), 8, %s133_s23 }
  0x18   : > { %p135_p9 = scmp.lt.s32.totalorder (%p651_p3), %s134_s25, 7  ;;  %s132_s30 = scalar_lea.vmem (%p651_p3), [#allocation2], %s419_s24 }
  0x1a   : > { %s772_s25 = smov (!%p135_p9, %s134_s25), 7 }
  0x1b   : > { %s408_s26 = sshll.u32 %s772_s25, 3 }
  0x1c   : > { %s138_s27 = ssub.s32 56, %s408_s26 }
  0x1d   : > { %s139_s28 = sshll.u32 %s138_s27, 4 }
  0x1e   : > { %140 = vsyncadd %s673_s29, %s139_s28  ;;  %p676_p10 = scmp.ne.s32.totalorder %s408_s26, 0  ;;  %s418_s4 = smul.u32 56, %s592_s13 }
  0x1f   : > { %s412_s5 = sshll.u32 %s772_s25, 7  ;;  %s682_s6 = sshll.u32 %s132_s30, 4  ;;  %s151_s6 = int_to_ptr.vmem [resolvable:$true] %s682_s6 }
  0x20   : > { %s145_s9 = scalar_lea.hbm %s758_s0, %s418_s4  ;;  %s477_s19 = sshrl.u32 %s412_s5, 4 }
  0x21   : > { %s148_s15 = sshll.u32 %s145_s9, 4  ;;  %s486_s26 = scalar_lea.hbm %s758_s0, 64  ;;  %s149_s15 = int_to_ptr.hbm [resolvable:$true] %s148_s15 }
  0x22   : > { %s475_s17 = sshra.s32 %s149_s15, 4  ;;  %s476_s17 = int_to_ptr.hbm [resolvable:$true] %s475_s17 }
  0x23   : > { %s482_s22 = scalar_lea.hbm %s476_s17, %s477_s19 }
  0x24   : > { %p483_p11 = scmp.ne.s32.totalorder %s476_s17, %s482_s22  ;;  %p488_p0 = scmp.lt.s32.totalorder %s486_s26, %s482_s22 }
  0x26   : > { %p484_p12 = pnand %p483_p11, %p676_p10 }
  0x28   : > { %p485_p13 = pneg %p484_p12 }
  0x2a   : > { %p490_p1 = pnand %p488_p0, %p485_p13 }
  0x2c   : > { %493 = shalt.err (!%p490_p1)
}
  0x2d   : > { %s494_s27 = sshra.s32 %s151_s6, 4  ;;  %s598_s30 = smov [#allocation2]   ;;  %s495_s27 = int_to_ptr.vmem [resolvable:$true] %s494_s27 }
  0x2e   : > { %s501_s28 = scalar_lea.vmem %s495_s27, %s477_s19  ;;  %s505_s4 = scalar_lea.vmem %s598_s30, 112 }
  0x2f   : > { %p502_p2 = scmp.ne.s32.totalorder %s495_s27, %s501_s28  ;;  %p507_p6 = scmp.lt.s32.totalorder %s505_s4, %s501_s28 }
  0x31   : > { %p503_p4 = pnand %p502_p2, %p676_p10 }
  0x33   : > { %p504_p5 = pneg %p503_p4 }
  0x35   : > { %p509_p8 = pnand %p507_p6, %p504_p5 }
  0x37   : > { %512 = shalt.err (!%p509_p8)
}
  0x38   : > { %153 = dma.hbm_to_vmem [thread:$0]  (%p676_p10), %s149_s15, %s412_s5, %s151_s6, %s673_s29  }
  0x39 PF: > { %s157_s7 = sand.u32 1, %s584_s11   ;;  %s162_s8 = smul.u32 7, %s592_s13 }
  0x3a   : > { %s420_s9 = smul.u32 7, %s157_s7  ;;  %s158_s3 = scalar_lea.sflag [#allocation5], %s157_s7 }
  0x3b   : > { %s165_s22 = scalar_lea.hbm %s759_s1, %s162_s8 }
  0x3c   : > { %s167_s23 = sshll.u32 %s165_s22, 4  ;;  %s161_s24 = scalar_lea.vmem [#allocation4], %s420_s9  ;;  %s168_s23 = int_to_ptr.hbm [resolvable:$true] %s167_s23 }
  0x3d   : > { %s169_s26 = sshll.u32 %s161_s24, 4  ;;  %s170_s26 = int_to_ptr.vmem [resolvable:$true] %s169_s26 }
  0x3e   : > { %423 = dma.hbm_to_vmem [thread:$0]  (%p651_p3), %s168_s23, 112, %s170_s26, %s158_s3  }
  0x3f PF: > { %p413_p9 = scmp.ge.s32.totalorder %s596_s14, 1  ;;  %p174_p10 = scmp.lt.s32.totalorder %s596_s14, 3 }
  0x41   : > { %p175_p11 = pnand %p413_p9, %p174_p10 }
  0x42   : > { %s180_s25 = sand.u32 (!%p175_p11), 1, %s580_s10  }
  0x43   : > { %178 = sbr.rel (%p175_p11) target bundleno = 227 (0xe3), region = 28  ;;  %s181_s5 = scalar_lea.sflag (!%p175_p11), [#allocation3], %s180_s25 }
  0x44   : > { %s421_s29 = smul.u32 (!%p175_p11), 56, %s180_s25 }
  0x46   : > { %s712_s6 = scalar_lea.vmem (!%p175_p11), [#allocation2], %s421_s29 }
  0x48   : > { %567 = dma.done.wait (%p658_p7), %s181_s5, 896  }
  0x49   : > { %569 = vsyncadd (%p658_p7), %s181_s5, 4294966400  ;;  %s422_s18 = smul.u32 7, %s180_s25  ;;  %s191_s15 = scalar_lea.sflag [#allocation5], %s180_s25 }
  0x4b   : > { %s194_s27 = scalar_lea.vmem [#allocation4], %s422_s18 }
  0x4c   : > { %571 = dma.done.wait (%p658_p7), %s191_s15, 112  }
  0x4d   : > { %573 = vsyncadd (%p658_p7), %s191_s15, 4294967184  ;;  %p414_p3 = scmp.ne.s32.totalorder %s588_s12, 0 }
  0x4f   : > { %233 = sbr.rel (%p414_p3) target bundleno = 86 (0x56), region = 40 }
  0x54   : > { %vm234_vm0 = vcmask 7168   ;;  %v599_v0 = vmov 0.0  }
  0x55   : > { %235 = vst.msk [vmem:[%s760_s2] sm:$0xff] %vm234_vm0, %v599_v0 }
  0x56 PF: > { %v266_v1 = vlaneseq  ;;  %s274_s4 = smul.u32 896, %s588_s12  ;;  %v243_v2 = vld [vmem:[%s194_s27] sm:$0xff]  ;;  %v237_v7 = vld [vmem:[%s712_s6 + $0x8] sm:$0xff]  ;;  %vm307_vm8 = vcmask 7168  }
  0x57   : > { %v236_v4 = vld [vmem:[%s712_s6] sm:$0xff]  ;;  %v245_v5 = vperm.slane %v243_v2, 0  ;;  %v246_v6 = vperm.slane %v243_v2, 1  ;;  %v247_v8 = vperm.slane %v243_v2, 2  ;;  %v238_v10 = vld [vmem:[%s712_s6 + $0x10] sm:$0xff]  ;;  %v248_v12 = vperm.slane %v243_v2, 3 }
  0x58   : > { %v267_v3 = vand.u32 127, %v266_v1  ;;  %v275_v11 = vstv %s274_s4  ;;  %v249_v13 = vperm.slane %v243_v2, 4  ;;  %v239_v16 = vld [vmem:[%s712_s6 + $0x18] sm:$0xff]  ;;  %v240_v25 = vld [vmem:[%s712_s6 + $0x20] sm:$0xff]  ;;  %v250_v26 = vperm.slane %v243_v2, 5  ;;  %v241_v31 = vld [vmem:[%s712_s6 + $0x28] sm:$0xff] }
  0x59   : > { %v259_v14 = vmul.f32 %v245_v5, %v236_v4  ;;  %v260_v17 = vmul.f32 %v246_v6, %v237_v7  ;;  %v261_v21 = vmul.f32 %v247_v8, %v238_v10  ;;  %v262_v30 = vmul.f32 %v248_v12, %v239_v16  ;;  %v242_v38 = vld [vmem:[%s712_s6 + $0x30] sm:$0xff] }
  0x5a   : > { %v268_v9 = vadd.s32 128, %v267_v3  ;;  %v269_v15 = vadd.s32 256, %v267_v3  ;;  %v270_v18 = vadd.s32 384, %v267_v3  ;;  %v271_v19 = vadd.s32 512, %v267_v3 }
  0x5b   : > { %v272_v20 = vadd.s32 640, %v267_v3  ;;  %v276_v22 = vadd.s32 %v275_v11, %v267_v3  ;;  %v273_v27 = vadd.s32 768, %v267_v3  ;;  %v251_v32 = vperm.slane %v243_v2, 6 }
  0x5c   : > { %v277_v23 = vadd.s32 %v275_v11, %v268_v9  ;;  %v278_v24 = vadd.s32 %v275_v11, %v269_v15  ;;  %v279_v28 = vadd.s32 %v275_v11, %v270_v18  ;;  %v280_v29 = vadd.s32 %v275_v11, %v271_v19  ;;  %v297_v52 = vld [vmem:[%s760_s2] sm:$0xff] }
  0x5d   : > { %vm283_vm1 = vcmp.lt.s32.totalorder %v276_v22, 900  ;;  %v281_v33 = vadd.s32 %v275_v11, %v272_v20  ;;  %v263_v34 = vmul.f32 %v249_v13, %v240_v25  ;;  %v282_v39 = vadd.s32 %v275_v11, %v273_v27 }
  0x5e   : > { %vm284_vm2 = vcmp.lt.s32.totalorder %v277_v23, 900  ;;  %vm285_vm3 = vcmp.lt.s32.totalorder %v278_v24, 900  ;;  %vm286_vm4 = vcmp.lt.s32.totalorder %v279_v28, 900  ;;  %v290_v35 = vsel %vm283_vm1, %v259_v14, 0.0 }
  0x5f   : > { %v291_v36 = vsel %vm284_vm2, %v260_v17, 0.0  ;;  %v292_v37 = vsel %vm285_vm3, %v261_v21, 0.0  ;;  %vm287_vm5 = vcmp.lt.s32.totalorder %v280_v29, 900  ;;  %v264_v41 = vmul.f32 %v250_v26, %v241_v31 }
  0x60   : > { %v298_v40 = vadd.f32 %v291_v36, %v290_v35  ;;  %v293_v42 = vsel %vm286_vm4, %v262_v30, 0.0  ;;  %vm288_vm6 = vcmp.lt.s32.totalorder %v281_v33, 900  ;;  %v265_v44 = vmul.f32 %v251_v32, %v242_v38 }
  0x61   : > { %v294_v45 = vsel %vm287_vm5, %v263_v34, 0.0  ;;  %vm289_vm7 = vcmp.lt.s32.totalorder %v282_v39, 900  ;;  %v295_v47 = vsel %vm288_vm6, %v264_v41, 0.0 }
  0x62   : > { %v299_v43 = vadd.f32 %v298_v40, %v292_v37  ;;  %v296_v49 = vsel %vm289_vm7, %v265_v44, 0.0 }
  0x64   : > { %v300_v46 = vadd.f32 %v299_v43, %v293_v42 }
  0x66   : > { %v301_v48 = vadd.f32 %v300_v46, %v294_v45 }
  0x68   : > { %v302_v50 = vadd.f32 %v301_v48, %v295_v47 }
  0x6a   : > { %v303_v51 = vadd.f32 %v302_v50, %v296_v49 }
  0x6c   : > { %304 = vadd.xlane.f32.xlu0 %v303_v51 }
  0xdf   : > { %v305_v53 = vpop.xlane.xlu0 %304 }
  0xe0   : > { %v306_v54 = vadd.f32 %v305_v53, %v297_v52 }
  0xe2   : > { %308 = vst.msk [vmem:[%s760_s2] sm:$0xff] %vm307_vm8, %v306_v54 }
  0xe3 PF: > { %s18_s14 = sadd.s32 1, %s596_s14   ;;  %s764_s9 = smov %s580_s10 }
  0xe4   : > { %p15_p7 = scmp.ge.s32.totalorder %s18_s14, 4   ;;  %s765_s10 = smov %s584_s11 }
  0xe5   : > { %s766_s11 = smov %s663_s21  ;;  %s767_s12 = smov %s592_s13 }
  0xe6   : > { %s768_s13 = smov %s770_s16  ;;  %17 = sbr.rel (!%p15_p7) target bundleno = 6 (0x6), region = 85 }
  0xeb   :  { %328 = vsyncpa [#allocation3], 1 }
  0xec   :  { %330 = vsyncpa [#allocation3 + $0x1], 1 }
  0xed   :  { %331 = vsyncpa [#allocation5], 1 }
  0xee   :  { %333 = vsyncpa [#allocation5 + $0x1], 1 }

</bundles_post_ra>
